<compile_context>
chip_gen: v6e
topology: v6e:2x2x1
jax: 0.10.0
libtpu: 0.0.40
codegen_flags: <defaults>
</compile_context>

<pallas_src>
import functools

import jax
import jax.numpy as jnp
from jax.experimental import pallas as pl
from jax.experimental.pallas import tpu as pltpu

_LN_EPS = 1e-5


def _residual_block_kernel(
    x_ref,      # [TB, F_in]
    w1_ref,     # [F_in, H]
    b1_ref,     # [1, H]
    w2_ref,     # [H, Fp]      fc2 weight, output dim zero-padded to lane-dense Fp (mult of 128)
    ws_ref,     # [F_in, Fp]   shortcut weight, zero-padded
    bias_ref,   # [1, Fp]      b2 + bs folded into one bias, zero-padded
    gamma_ref,  # [1, Fp]      LayerNorm scale, zero-padded
    beta_ref,   # [1, Fp]      LayerNorm shift, zero-padded
    o_ref,      # [TB, Fp]
    *,
    f_out,      # static: number of real (unpadded) output features
):
    x = x_ref[...]

    # fc1 + ReLU (MXU matmul, f32 accumulation).
    h = jnp.dot(x, w1_ref[...], preferred_element_type=jnp.float32) + b1_ref[...]
    h = jnp.maximum(h, 0.0)

    # fc2 + shortcut Linear, both projecting into the lane-dense padded output space.
    # b2 and bs were pre-folded into a single bias in the wrapper.
    out = (
        jnp.dot(h, w2_ref[...], preferred_element_type=jnp.float32)
        + jnp.dot(x, ws_ref[...], preferred_element_type=jnp.float32)
        + bias_ref[...]
    )
    # dropout: identity (eval mode).

    # LayerNorm over the first `f_out` real lanes only. Padded lanes of `out` are exactly
    # zero by construction (zero-padded weights + bias), so the plain sum equals the sum
    # over the real lanes; the variance needs an explicit mask because centering makes the
    # padded lanes nonzero.
    inv_n = jnp.float32(1.0 / f_out)
    lane = jax.lax.broadcasted_iota(jnp.int32, out.shape, 1)
    mask = (lane < f_out).astype(jnp.float32)

    mean = jnp.sum(out, axis=-1, keepdims=True) * inv_n
    cent = out - mean
    var = jnp.sum(mask * cent * cent, axis=-1, keepdims=True) * inv_n
    normed = cent * jax.lax.rsqrt(var + _LN_EPS)

    # gamma/beta are zero in the padded lanes -> padded output lanes are exactly 0
    # (sliced off in the wrapper anyway). Full 128-lane unmasked stores.
    o_ref[...] = (normed * gamma_ref[...] + beta_ref[...]).astype(o_ref.dtype)


def _pick_tile_b(batch):
    """Large fixed tile, but always >= 2 grid steps when the batch allows it (v7x megacore)."""
    tile = 512
    while tile > 8 and tile * 2 > batch:
        tile //= 2
    return max(tile, 8)


def residual_block(x, params, *, tile_b=None):
    """x: [B, F_in] float32. params: dict of weights (Linear weights stored [in, out]).

    Returns [B, F_out].
    """
    B, F_in = x.shape
    H = params["w1"].shape[1]
    F_out = params["w2"].shape[1]

    if tile_b is None:
        tile_b = _pick_tile_b(B)
    tile_b = max(8, (tile_b // 8) * 8)  # sublane-aligned

    n_tiles = pl.cdiv(B, tile_b)
    B_pad = n_tiles * tile_b
    if B_pad != B:
        x = jnp.pad(x, ((0, B_pad - B), (0, 0)))

    # Lane-dense output space: pad the output-feature dim to a multiple of 128.
    Fp = ((F_out + 127) // 128) * 128
    pad = Fp - F_out
    w2_p = jnp.pad(params["w2"], ((0, 0), (0, pad)))
    ws_p = jnp.pad(params["ws"], ((0, 0), (0, pad)))
    bias_p = jnp.pad(params["b2"] + params["bs"], ((0, 0), (0, pad)))
    gamma_p = jnp.pad(params["gamma"], ((0, 0), (0, pad)))
    beta_p = jnp.pad(params["beta"], ((0, 0), (0, pad)))

    x_map = lambda i: (i, 0)
    const_map = lambda i: (0, 0)  # weights/bias reuse the same block -> no per-step re-DMA

    out_padded = pl.pallas_call(
        functools.partial(_residual_block_kernel, f_out=F_out),
        out_shape=jax.ShapeDtypeStruct((B_pad, Fp), x.dtype),
        grid_spec=pltpu.PrefetchScalarGridSpec(
            num_scalar_prefetch=0,
            grid=(n_tiles,),
            in_specs=[
                pl.BlockSpec((tile_b, F_in), x_map),
                pl.BlockSpec((F_in, H), const_map),
                pl.BlockSpec((1, H), const_map),
                pl.BlockSpec((H, Fp), const_map),
                pl.BlockSpec((F_in, Fp), const_map),
                pl.BlockSpec((1, Fp), const_map),
                pl.BlockSpec((1, Fp), const_map),
                pl.BlockSpec((1, Fp), const_map),
            ],
            out_specs=pl.BlockSpec((tile_b, Fp), x_map),
        ),
        compiler_params=pltpu.CompilerParams(
            dimension_semantics=("parallel",),
            vmem_limit_bytes=32 * 1024 * 1024,  # headroom above v5e's 16 MiB default scope
        ),
    )(x, params["w1"], params["b1"], w2_p, ws_p, bias_p, gamma_p, beta_p)

    return out_padded[:B, :F_out]


def init_params(key, in_features, hid_features, out_features):
    """Deterministic synthetic init (PyTorch Linear weights stored transposed: [in, out])."""
    ks = jax.random.split(key, 6)
    s1 = 1.0 / jnp.sqrt(in_features)
    s2 = 1.0 / jnp.sqrt(hid_features)
    return {
        "w1": jax.random.uniform(ks[0], (in_features, hid_features), jnp.float32, -s1, s1),
        "b1": jax.random.uniform(ks[1], (1, hid_features), jnp.float32, -s1, s1),
        "w2": jax.random.uniform(ks[2], (hid_features, out_features), jnp.float32, -s2, s2),
        "b2": jax.random.uniform(ks[3], (1, out_features), jnp.float32, -s2, s2),
        "ws": jax.random.uniform(ks[4], (in_features, out_features), jnp.float32, -s1, s1),
        "bs": jax.random.uniform(ks[5], (1, out_features), jnp.float32, -s1, s1),
        "gamma": jnp.ones((1, out_features), jnp.float32),
        "beta": jnp.zeros((1, out_features), jnp.float32),
    }


def _reference(x, p):
    h = jnp.maximum(x @ p["w1"] + p["b1"], 0.0)
    out = h @ p["w2"] + p["b2"]
    out = out + (x @ p["ws"] + p["bs"])
    mean = jnp.mean(out, axis=-1, keepdims=True)
    var = jnp.mean(jnp.square(out - mean), axis=-1, keepdims=True)
    out = (out - mean) * jax.lax.rsqrt(var + _LN_EPS)
    return out * p["gamma"] + p["beta"]


if __name__ == "__main__":
    key = jax.random.PRNGKey(0)
    k_x, k_p = jax.random.split(key)

    batch = 256            # default tile heuristic -> tile_b=128, grid=(2,) (pipelined, 2 TCs on v7x)
    in_features = 32
    hid_features = 64
    out_features = 16      # != in_features -> shortcut is a Linear, as in the module

    x = jax.random.normal(k_x, (batch, in_features), jnp.float32)
    params = init_params(k_p, in_features, hid_features, out_features)

    out = residual_block(x, params)
    out = jax.block_until_ready(out)

    ref = _reference(x, params)
    assert out.shape == (batch, out_features)
    assert jnp.allclose(out, ref, atol=1e-3, rtol=1e-3), "mismatch vs pure-JAX reference"

    print("KERNEL_OK")
</pallas_src>

<mosaic_0001>
module attributes {stable_mosaic.version = 11 : i64} {
  func.func @_residual_block_kernel(%arg0: i32, %arg1: memref<128x32xf32, #tpu.memory_space<vmem>>, %arg2: memref<32x64xf32, #tpu.memory_space<vmem>>, %arg3: memref<1x64xf32, #tpu.memory_space<vmem>>, %arg4: memref<64x128xf32, #tpu.memory_space<vmem>>, %arg5: memref<32x128xf32, #tpu.memory_space<vmem>>, %arg6: memref<1x128xf32, #tpu.memory_space<vmem>>, %arg7: memref<1x128xf32, #tpu.memory_space<vmem>>, %arg8: memref<1x128xf32, #tpu.memory_space<vmem>>, %arg9: memref<128x128xf32, #tpu.memory_space<vmem>>) attributes {dimension_semantics = [#tpu.dimension_semantics<parallel>], iteration_bounds = array<i64: 2>, scalar_prefetch = 0 : i64, scratch_operands = 0 : i64, tpu.core_type = #tpu.core_type<tc>, window_params = [{transform_indices = @transform_0, window_bounds = array<i64: 128, 32>}, {pipeline_mode = #tpu.pipeline_mode<synchronous>, transform_indices = @transform_1, window_bounds = array<i64: 32, 64>}, {pipeline_mode = #tpu.pipeline_mode<synchronous>, transform_indices = @transform_2, window_bounds = array<i64: 1, 64>}, {pipeline_mode = #tpu.pipeline_mode<synchronous>, transform_indices = @transform_3, window_bounds = array<i64: 64, 128>}, {pipeline_mode = #tpu.pipeline_mode<synchronous>, transform_indices = @transform_4, window_bounds = array<i64: 32, 128>}, {pipeline_mode = #tpu.pipeline_mode<synchronous>, transform_indices = @transform_5, window_bounds = array<i64: 1, 128>}, {pipeline_mode = #tpu.pipeline_mode<synchronous>, transform_indices = @transform_6, window_bounds = array<i64: 1, 128>}, {pipeline_mode = #tpu.pipeline_mode<synchronous>, transform_indices = @transform_7, window_bounds = array<i64: 1, 128>}, {transform_indices = @transform_8, window_bounds = array<i64: 128, 128>}]} {
    %c0 = arith.constant 0 : index
    %c0_0 = arith.constant 0 : index
    %0 = vector.load %arg1[%c0, %c0_0] : memref<128x32xf32, #tpu.memory_space<vmem>>, vector<128x32xf32>
    %c0_1 = arith.constant 0 : index
    %c0_2 = arith.constant 0 : index
    %1 = vector.load %arg2[%c0_1, %c0_2] : memref<32x64xf32, #tpu.memory_space<vmem>>, vector<32x64xf32>
    %cst = arith.constant dense<0.000000e+00> : vector<128x64xf32>
    %2 = tpu.matmul %0, %1, %cst {dimension_numbers = #tpu.dot_dimension_numbers<[1], [0], [0], [1], [0, 0, 1, 1], [], []>} : vector<128x32xf32>, vector<32x64xf32>, vector<128x64xf32> -> vector<128x64xf32>
    %c0_3 = arith.constant 0 : index
    %c0_4 = arith.constant 0 : index
    %3 = vector.load %arg3[%c0_3, %c0_4] : memref<1x64xf32, #tpu.memory_space<vmem>>, vector<1x64xf32>
    %4 = vector.broadcast %3 : vector<1x64xf32> to vector<128x64xf32>
    %5 = arith.addf %2, %4 : vector<128x64xf32>
    %cst_5 = arith.constant 0.000000e+00 : f32
    %6 = vector.broadcast %cst_5 : f32 to vector<128x64xf32>
    %7 = arith.maximumf %5, %6 : vector<128x64xf32>
    %c0_6 = arith.constant 0 : index
    %c0_7 = arith.constant 0 : index
    %8 = vector.load %arg4[%c0_6, %c0_7] : memref<64x128xf32, #tpu.memory_space<vmem>>, vector<64x128xf32>
    %cst_8 = arith.constant dense<0.000000e+00> : vector<128x128xf32>
    %9 = tpu.matmul %7, %8, %cst_8 {dimension_numbers = #tpu.dot_dimension_numbers<[1], [0], [0], [1], [0, 0, 1, 1], [], []>} : vector<128x64xf32>, vector<64x128xf32>, vector<128x128xf32> -> vector<128x128xf32>
    %c0_9 = arith.constant 0 : index
    %c0_10 = arith.constant 0 : index
    %10 = vector.load %arg5[%c0_9, %c0_10] : memref<32x128xf32, #tpu.memory_space<vmem>>, vector<32x128xf32>
    %cst_11 = arith.constant dense<0.000000e+00> : vector<128x128xf32>
    %11 = tpu.matmul %0, %10, %cst_11 {dimension_numbers = #tpu.dot_dimension_numbers<[1], [0], [0], [1], [0, 0, 1, 1], [], []>} : vector<128x32xf32>, vector<32x128xf32>, vector<128x128xf32> -> vector<128x128xf32>
    %12 = arith.addf %9, %11 : vector<128x128xf32>
    %c0_12 = arith.constant 0 : index
    %c0_13 = arith.constant 0 : index
    %13 = vector.load %arg6[%c0_12, %c0_13] : memref<1x128xf32, #tpu.memory_space<vmem>>, vector<1x128xf32>
    %14 = vector.broadcast %13 : vector<1x128xf32> to vector<128x128xf32>
    %15 = arith.addf %12, %14 : vector<128x128xf32>
    %16 = tpu.iota {dimensions = array<i32: 1>} : vector<128x128xi32>
    %c16_i32 = arith.constant 16 : i32
    %17 = vector.broadcast %c16_i32 : i32 to vector<128x128xi32>
    %18 = arith.cmpi slt, %16, %17 : vector<128x128xi32>
    %19 = arith.extui %18 : vector<128x128xi1> to vector<128x128xi32>
    %20 = arith.sitofp %19 : vector<128x128xi32> to vector<128x128xf32>
    %cst_14 = arith.constant dense<0.000000e+00> : vector<128xf32>
    %21 = vector.multi_reduction <add>, %15, %cst_14 [1] : vector<128x128xf32> to vector<128xf32>
    %22 = vector.shape_cast %21 : vector<128xf32> to vector<128x1xf32>
    %cst_15 = arith.constant 6.250000e-02 : f32
    %23 = vector.broadcast %cst_15 : f32 to vector<128x1xf32>
    %24 = arith.mulf %22, %23 : vector<128x1xf32>
    %25 = vector.broadcast %24 : vector<128x1xf32> to vector<128x128xf32>
    %26 = arith.subf %15, %25 : vector<128x128xf32>
    %27 = arith.mulf %20, %26 : vector<128x128xf32>
    %28 = arith.mulf %27, %26 : vector<128x128xf32>
    %cst_16 = arith.constant dense<0.000000e+00> : vector<128xf32>
    %29 = vector.multi_reduction <add>, %28, %cst_16 [1] : vector<128x128xf32> to vector<128xf32>
    %30 = vector.shape_cast %29 : vector<128xf32> to vector<128x1xf32>
    %cst_17 = arith.constant 6.250000e-02 : f32
    %31 = vector.broadcast %cst_17 : f32 to vector<128x1xf32>
    %32 = arith.mulf %30, %31 : vector<128x1xf32>
    %cst_18 = arith.constant 9.99999974E-6 : f32
    %33 = vector.broadcast %cst_18 : f32 to vector<128x1xf32>
    %34 = arith.addf %32, %33 : vector<128x1xf32>
    %35 = math.rsqrt %34 : vector<128x1xf32>
    %36 = vector.broadcast %35 : vector<128x1xf32> to vector<128x128xf32>
    %37 = arith.mulf %26, %36 : vector<128x128xf32>
    %c0_19 = arith.constant 0 : index
    %c0_20 = arith.constant 0 : index
    %38 = vector.load %arg7[%c0_19, %c0_20] : memref<1x128xf32, #tpu.memory_space<vmem>>, vector<1x128xf32>
    %39 = vector.broadcast %38 : vector<1x128xf32> to vector<128x128xf32>
    %40 = arith.mulf %37, %39 : vector<128x128xf32>
    %c0_21 = arith.constant 0 : index
    %c0_22 = arith.constant 0 : index
    %41 = vector.load %arg8[%c0_21, %c0_22] : memref<1x128xf32, #tpu.memory_space<vmem>>, vector<1x128xf32>
    %42 = vector.broadcast %41 : vector<1x128xf32> to vector<128x128xf32>
    %43 = arith.addf %40, %42 : vector<128x128xf32>
    %c0_23 = arith.constant 0 : index
    %c0_24 = arith.constant 0 : index
    %44 = vector.load %arg9[%c0_23, %c0_24] : memref<128x128xf32, #tpu.memory_space<vmem>>, vector<128x128xf32>
    tpu.vector_store %arg9[%c0_23, %c0_24], %43 {strides = array<i32>} : memref<128x128xf32, #tpu.memory_space<vmem>>, vector<128x128xf32>,
    return
  }
  func.func @transform_0(%arg0: i32) -> (i32, i32) {
    %c0_i32 = arith.constant 0 : i32
    %c0_i32_0 = arith.constant 0 : i32
    return %arg0, %c0_i32 : i32, i32
  }
  func.func @transform_1(%arg0: i32) -> (i32, i32) {
    %c0_i32 = arith.constant 0 : i32
    %c0_i32_0 = arith.constant 0 : i32
    %c0_i32_1 = arith.constant 0 : i32
    return %c0_i32, %c0_i32_0 : i32, i32
  }
  func.func @transform_2(%arg0: i32) -> (i32, i32) {
    %c0_i32 = arith.constant 0 : i32
    %c0_i32_0 = arith.constant 0 : i32
    %c0_i32_1 = arith.constant 0 : i32
    return %c0_i32, %c0_i32_0 : i32, i32
  }
  func.func @transform_3(%arg0: i32) -> (i32, i32) {
    %c0_i32 = arith.constant 0 : i32
    %c0_i32_0 = arith.constant 0 : i32
    %c0_i32_1 = arith.constant 0 : i32
    return %c0_i32, %c0_i32_0 : i32, i32
  }
  func.func @transform_4(%arg0: i32) -> (i32, i32) {
    %c0_i32 = arith.constant 0 : i32
    %c0_i32_0 = arith.constant 0 : i32
    %c0_i32_1 = arith.constant 0 : i32
    return %c0_i32, %c0_i32_0 : i32, i32
  }
  func.func @transform_5(%arg0: i32) -> (i32, i32) {
    %c0_i32 = arith.constant 0 : i32
    %c0_i32_0 = arith.constant 0 : i32
    %c0_i32_1 = arith.constant 0 : i32
    return %c0_i32, %c0_i32_0 : i32, i32
  }
  func.func @transform_6(%arg0: i32) -> (i32, i32) {
    %c0_i32 = arith.constant 0 : i32
    %c0_i32_0 = arith.constant 0 : i32
    %c0_i32_1 = arith.constant 0 : i32
    return %c0_i32, %c0_i32_0 : i32, i32
  }
  func.func @transform_7(%arg0: i32) -> (i32, i32) {
    %c0_i32 = arith.constant 0 : i32
    %c0_i32_0 = arith.constant 0 : i32
    %c0_i32_1 = arith.constant 0 : i32
    return %c0_i32, %c0_i32_0 : i32, i32
  }
  func.func @transform_8(%arg0: i32) -> (i32, i32) {
    %c0_i32 = arith.constant 0 : i32
    %c0_i32_0 = arith.constant 0 : i32
    return %arg0, %c0_i32 : i32, i32
  }
}

</mosaic_0001>

<bundles_post_ra>
// kernel: tpu_custom_call.1
= control target key start
LH: loop header
LB: loop body
LE: loop exit
PB: predicated region body
PF: predicated region fallthrough
CT: control target
= control target key end

     0   :  { %13 = vsyncpa [#allocation3], 0  ;;  %s2166_s0 = inlined_call_operand.vmem [shape: f32[256,32], index: 0, kind: input, shape index: {}]   ;;  %s2167_s1 = inlined_call_operand.vmem [shape: f32[32,64], index: 1, kind: input, shape index: {}]   ;;  %s2168_s2 = inlined_call_operand.vmem [shape: f32[1,64], index: 2, kind: input, shape index: {}]   ;;  %s2169_s3 = inlined_call_operand.vmem [shape: f32[64,128], index: 3, kind: input, shape index: {}]   ;;  %s2170_s4 = inlined_call_operand.vmem [shape: f32[32,128], index: 4, kind: input, shape index: {}]   ;;  %s2171_s5 = inlined_call_operand.vmem [shape: f32[1,128], index: 5, kind: input, shape index: {}]   ;;  %s2172_s6 = inlined_call_operand.vmem [shape: f32[1,128], index: 6, kind: input, shape index: {}]   ;;  %s2173_s7 = inlined_call_operand.vmem [shape: f32[1,128], index: 7, kind: input, shape index: {}]   ;;  %s2174_s8 = inlined_call_operand.hbm [shape: f32[256,128], index: 8, kind: output, shape index: {}]  }
   0x1   :  { %15 = vsyncpa [#allocation3 + $0x1], 0  ;;  %s1680_s27 = smov 0   ;;  %s1682_s28 = smov 0  }
   0x2   :  { %s1684_s29 = smov 0   ;;  %s1686_s30 = smov 0  }
   0x3 LB: > { %s1701_s9 = sadd.s32 4294967295, %s1629_s30   ;;  %s1253_s10 = sadd.s32 4294967294, %s1629_s30   ;;  %s1629_s30 = sphi %s1686_s30, %s2180_s30   ;;  %s1625_s29 = sphi %s1684_s29, %s2179_s29   ;;  %s1621_s28 = sphi %s1682_s28, %s2178_s28   ;;  %s1617_s27 = sphi %s1680_s27, %s2177_s27  }
   0x4   : > { %s1705_s11 = sadd.s32 1, %s1629_s30   ;;  %s201_s12 = sadd.s32 1, %s1625_s29 }
   0x5   : > { %s198_s13 = ssub.s32 %s1629_s30, %s1705_s11  ;;  %p211_p0 = scmp.ne.s32.totalorder %s1625_s29, %s1621_s28 }
   0x6   : > { %p199_p1 = scmp.eq.s32.totalorder %s198_s13, 0  ;;  %p212_p2 = scmp.eq.s32.totalorder %s1701_s9, 1 }
   0x7   : > { %p217_p3 = scmp.ne.s32.totalorder %s1621_s28, %s1617_s27  ;;  %p218_p4 = scmp.eq.s32.totalorder %s1253_s10, 1 }
   0x8   : > { %s1716_s14 = scalar_select %p199_p1, %s1625_s29, %s201_s12  }
   0x9   : > { %p1718_p5 = por %p212_p2, %p211_p0  ;;  %p1722_p6 = por %p218_p4, %p217_p3 }
   0xa   : > { %p1256_p7 = scmp.ge.s32.totalorder %s1629_s30, 1  ;;  %p266_p8 = scmp.lt.s32.totalorder %s1629_s30, 3 }
   0xc   : > { %p267_p9 = pnand %p1256_p7, %p266_p8 }
   0xd   : > { %s1258_s21 = sshll.u32 (!%p267_p9), %s1701_s9, 4  ;;  %s297_s20 = sand.u32 (!%p267_p9), 1, %s1621_s28  }
   0xe   : > { %270 = sbr.rel (%p267_p9) target bundleno = 780 (0x30c), region = 52  ;;  %p301_p10 = scmp.lt.s32.totalorder (!%p267_p9), %s1258_s21, 31 }
  0x13   : > { %v326_v0 = vld [vmem:[%s2167_s1 + $0x18] sm:$0xff]  ;;  %v325_v1 = vld [vmem:[%s2167_s1 + $0x10] sm:$0xff]  ;;  %v324_v2 = vld [vmem:[%s2167_s1 + $0x8] sm:$0xff]  ;;  %s2182_s21 = smov (!%p301_p10, %s1258_s21), 31  ;;  %vm334_vm0 = vcmask 261120   ;;  %vm701_vm1 = vcmask 523264  }
  0x14   : > { %1383 = vmatprep.subr.mxu0 %v326_v0  ;;  %1487 = vmatprep.subr.mxu1 %v326_v0  ;;  %v323_v3 = vld [vmem:[%s2167_s1] sm:$0xff]  ;;  %s1259_s26 = sshll.u32 %s2182_s21, 3  ;;  %v555_v7 = vld [vmem:[%s2170_s4 + $0x18] sm:$0xff]  ;;  %v550_v15 = vld [vmem:[%s2169_s3 + $0x30] sm:$0xff]  ;;  %s1632_s21 = smov [#allocation2]  }
  0x15   : > { %1384 = vmatpush3.msra.mxu0 %v326_v0  ;;  %1491 = vmatpush3.msra.mxu1 %v326_v0  ;;  %s1744_s13 = scalar_lea.vmem %s2166_s0, %s1259_s26  ;;  %v551_v9 = vld [vmem:[%s2169_s3 + $0x38] sm:$0xff]  ;;  %v554_v18 = vld [vmem:[%s2170_s4 + $0x10] sm:$0xff]  ;;  %v549_v20 = vld [vmem:[%s2169_s3 + $0x28] sm:$0xff]  ;;  %s1318_s26 = sshll.u32 %s1701_s9, 11 }
  0x16   : > { %1385 = vmatprep.subr.mxu0 %v325_v1  ;;  %1488 = vmatprep.subr.mxu1 %v325_v1  ;;  %v307_v4 = vld [vmem:[%s1744_s13] sm:$0xff]  ;;  %v1748_v5 = vld [vmem:[%s1744_s13 + $0x8] sm:$0xff]  ;;  %v1751_v6 = vld [vmem:[%s1744_s13 + $0x10] sm:$0xff]  ;;  %s2117_s18 = scalar_lea.hbm %s2174_s8, %s1318_s26  ;;  %s2126_s9 = scalar_lea.sflag [#allocation3], %s297_s20 }
  0x17   : > { %1386 = vmatpush3.msra.mxu0 %v325_v1  ;;  %1492 = vmatpush3.msra.mxu1 %v325_v1  ;;  %v1760_v8 = vld [vmem:[%s1744_s13 + $0x40] sm:$0xff]  ;;  %v310_v10 = vld [vmem:[%s1744_s13 + $0x18] sm:$0xff]  ;;  %v1771_v11 = vld [vmem:[%s1744_s13 + $0x48] sm:$0xff]  ;;  %s1573_s22 = sshll.u32 %s1632_s21, 4  ;;  %s1574_s22 = int_to_ptr.vmem [resolvable:$false] %s1573_s22 }
  0x18   : > { %1387 = vmatprep.subr.mxu0 %v324_v2  ;;  %1489 = vmatprep.subr.mxu1 %v324_v2  ;;  %v1774_v12 = vld [vmem:[%s1744_s13 + $0x50] sm:$0xff]  ;;  %v311_v13 = vld [vmem:[%s1744_s13 + $0x20] sm:$0xff]  ;;  %v318_v14 = vld [vmem:[%s1744_s13 + $0x58] sm:$0xff] }
  0x19   : > { %1388 = vmatpush3.msra.mxu0 %v324_v2  ;;  %1493 = vmatpush3.msra.mxu1 %v324_v2  ;;  %v319_v16 = vld [vmem:[%s1744_s13 + $0x60] sm:$0xff]  ;;  %v312_v17 = vld [vmem:[%s1744_s13 + $0x28] sm:$0xff]  ;;  %v313_v19 = vld [vmem:[%s1744_s13 + $0x30] sm:$0xff] }
  0x1a   : > { %1389 = vmatprep.subr.mxu0 %v323_v3  ;;  %1490 = vmatprep.subr.mxu1 %v323_v3  ;;  %v320_v21 = vld [vmem:[%s1744_s13 + $0x68] sm:$0xff]  ;;  %v321_v22 = vld [vmem:[%s1744_s13 + $0x70] sm:$0xff]  ;;  %v314_v23 = vld [vmem:[%s1744_s13 + $0x38] sm:$0xff] }
  0x1b   : > { %1390 = vmatpush3.msra.mxu0 %v323_v3  ;;  %1391 = vmatprep.mubr.msk.f32.mxu0 %vm334_vm0, %v307_v4  ;;  %v548_v24 = vld [vmem:[%s2169_s3 + $0x20] sm:$0xff]  ;;  %v553_v25 = vld [vmem:[%s2170_s4 + $0x8] sm:$0xff]  ;;  %v322_v26 = vld [vmem:[%s1744_s13 + $0x78] sm:$0xff]  ;;  %s1257_s13 = sshll.u32 %s297_s20, 7 }
  0x1c   : > { %1392 = vmatmul.mubr.msk.f32.vlgmr.msra.gmra.mxu0 %vm334_vm0, %v1748_v5  ;;  %1494 = vmatpush3.msra.mxu1 %v323_v3  ;;  %v547_v27 = vld [vmem:[%s2169_s3 + $0x18] sm:$0xff]  ;;  %v546_v28 = vld [vmem:[%s2169_s3 + $0x10] sm:$0xff]  ;;  %v552_v29 = vld [vmem:[%s2170_s4] sm:$0xff]  ;;  %s2054_s25 = scalar_lea.vmem [#allocation2], %s1257_s13  ;;  %s1575_s13 = scalar_lea.vmem %s1574_s22, 4096 }
  0x1d   : > { %1394 = vmatprep.mubr.msk.f32.mxu0 %vm334_vm0, %v1751_v6  ;;  %1403 = vmatprep.mubr.msk.f32.mxu1 %vm334_vm0, %v1760_v8  ;;  %v545_v30 = vld [vmem:[%s2169_s3 + $0x8] sm:$0xff]  ;;  %v544_v31 = vld [vmem:[%s2169_s3] sm:$0xff]  ;;  %s1191_s10 = sshll.u32 %s2054_s25, 4  ;;  %s2119_s10 = int_to_ptr.vmem [resolvable:$true] %s1191_s10 }
  0x1e   : > { %1404 = vmatmul.mubr.msk.f32.vlgmr.msra.gmra.mxu1 %vm334_vm0, %v1771_v11  ;;  %1415 = vmatprep.subr.mxu1 %v555_v7  ;;  %v1260_v32 = vld [vmem:[%s2168_s2] ss:$0 sm:$0xff]  ;;  %s1569_s19 = scalar_lea.vmem %s2119_s10, 2048  ;;  %p1576_p0 = scmp.lt.s32.totalorder %s2119_s10, %s1574_s22 }
  0x1f   : > { %1406 = vmatprep.mubr.msk.f32.mxu1 %vm334_vm0, %v1774_v12  ;;  %1447 = vmatprep.subr.mxu0 %v551_v9  ;;  %p1570_p11 = scmp.ne.s32.totalorder %s2119_s10, %s1569_s19  ;;  %p1577_p1 = scmp.lt.s32.totalorder %s1575_s13, %s1569_s19 }
  0x20   : > { %1395 = vmatmul.mubr.msk.f32.gmra.mxu0 %vm334_vm0, %v310_v10  ;;  %1416 = vmatpush3.msra.mxu1 %v555_v7 }
  0x21   : > { %1397 = vmatprep.mubr.msk.f32.mxu0 %vm334_vm0, %v311_v13  ;;  %1448 = vmatpush3.msra.mxu0 %v551_v9  ;;  %p1571_p12 = pnand %p1570_p11, %p1718_p5  ;;  %p1578_p2 = por %p1577_p1, %p1576_p0 }
  0x22   : > { %1407 = vmatmul.mubr.msk.f32.gmra.mxu1 %vm334_vm0, %v318_v14  ;;  %1449 = vmatprep.subr.mxu0 %v550_v15 }
  0x23   : > { %1409 = vmatprep.mubr.msk.f32.mxu1 %vm334_vm0, %v319_v16  ;;  %1450 = vmatpush3.msra.mxu0 %v550_v15  ;;  %p1572_p13 = pneg %p1571_p12 }
  0x24   : > { %1398 = vmatmul.mubr.msk.f32.gmra.mxu0 %vm334_vm0, %v312_v17  ;;  %1417 = vmatprep.subr.mxu1 %v554_v18 }
  0x25   : > { %1400 = vmatprep.mubr.msk.f32.mxu0 %vm334_vm0, %v313_v19  ;;  %1451 = vmatprep.subr.mxu0 %v549_v20  ;;  %p1579_p3 = pnand %p1578_p2, %p1572_p13 }
  0x26   : > { %1410 = vmatmul.mubr.msk.f32.gmra.mxu1 %vm334_vm0, %v320_v21  ;;  %1452 = vmatpush3.msra.mxu0 %v549_v20 }
  0x27   : > { %1412 = vmatprep.mubr.msk.f32.mxu1 %vm334_vm0, %v321_v22  ;;  %1418 = vmatpush3.msra.mxu1 %v554_v18 }
  0x28   : > { %1401 = vmatmul.mubr.msk.f32.gmra.mxu0 %vm334_vm0, %v314_v23  ;;  %1453 = vmatprep.subr.mxu0 %v548_v24 }
  0x29   : > { %1454 = vmatpush3.msra.mxu0 %v548_v24  ;;  %1419 = vmatprep.subr.mxu1 %v553_v25 }
  0x2a   : > { %1413 = vmatmul.mubr.msk.f32.gmra.mxu1 %vm334_vm0, %v322_v26  ;;  %1455 = vmatprep.subr.mxu0 %v547_v27 }
  0x2b   : > { %1420 = vmatpush3.msra.mxu1 %v553_v25  ;;  %1456 = vmatpush3.msra.mxu0 %v547_v27 }
  0x2c   : > { %1423 = vmatprep.mubr.msk.f32.mxu1 %vm334_vm0, %v307_v4  ;;  %1457 = vmatprep.subr.mxu0 %v546_v28 }
  0x2d   : > { %1458 = vmatpush3.msra.mxu0 %v546_v28  ;;  %1421 = vmatprep.subr.mxu1 %v552_v29 }
  0x2e   : > { %1459 = vmatprep.subr.mxu0 %v545_v30  ;;  %1422 = vmatpush3.msra.mxu1 %v552_v29 }
  0x2f   : > { %1460 = vmatpush3.msra.mxu0 %v545_v30  ;;  %1424 = vmatmul.mubr.msk.f32.vlgmr.msra.gmra.mxu1 %vm334_vm0, %v1748_v5 }
  0x30   : > { %1461 = vmatprep.subr.mxu0 %v544_v31  ;;  %1426 = vmatprep.mubr.msk.f32.mxu1 %vm334_vm0, %v1751_v6 }
  0x31   : > { %1462 = vmatpush3.msra.mxu0 %v544_v31 }
  0x33   : > { %1427 = vmatmul.mubr.msk.f32.gmra.mxu1 %vm334_vm0, %v310_v10 }
  0x34   : > { %1429 = vmatprep.mubr.msk.f32.mxu1 %vm334_vm0, %v311_v13 }
  0x37   : > { %1430 = vmatmul.mubr.msk.f32.gmra.mxu1 %vm334_vm0, %v312_v17 }
  0x38   : > { %1432 = vmatprep.mubr.msk.f32.mxu1 %vm334_vm0, %v313_v19 }
  0x3b   : > { %1433 = vmatmul.mubr.msk.f32.gmra.mxu1 %vm334_vm0, %v314_v23 }
  0x3c   : > { %1435 = vmatprep.mubr.msk.f32.mxu1 %vm334_vm0, %v1760_v8 }
  0x3f   : > { %1436 = vmatmul.mubr.msk.f32.gmra.mxu1 %vm334_vm0, %v1771_v11 }
  0x40   : > { %1438 = vmatprep.mubr.msk.f32.mxu1 %vm334_vm0, %v1774_v12 }
  0x43   : > { %1439 = vmatmul.mubr.msk.f32.gmra.mxu1 %vm334_vm0, %v318_v14 }
  0x44   : > { %1441 = vmatprep.mubr.msk.f32.mxu1 %vm334_vm0, %v319_v16 }
  0x47   : > { %1442 = vmatmul.mubr.msk.f32.gmra.mxu1 %vm334_vm0, %v320_v21 }
  0x48   : > { %1444 = vmatprep.mubr.msk.f32.mxu1 %vm334_vm0, %v321_v22 }
  0x4b   : > { %1445 = vmatmul.mubr.msk.f32.gmra.mxu1 %vm334_vm0, %v322_v26  ;;  %v1872_v26 = vld [vmem:[%s2171_s5] ss:$0 sm:$0xff] }
  0xdc   : > { %v1393_v33 = vpop.f32.mrf.mxu0 }
  0xdd   : > { %v455_v34 = vadd.f32 %v1393_v33, %v1260_v32 }
  0xde   : > { %v449_v35 = vpop.f32.mrf.mxu0  ;;  %v1405_v36 = vpop.f32.mrf.mxu1 }
  0xdf   : > { %v450_v37 = vadd.f32 %v1260_v32, %v449_v35  ;;  %v529_v41 = vmax.f32 %v455_v34, 0.0  ;;  %v495_v63 = vadd.f32 %v1405_v36, %v1260_v32 }
  0xe0   : > { %v1396_v38 = vpop.f32.mrf.mxu0  ;;  %v489_v39 = vpop.f32.mrf.mxu1 }
  0xe1   : > { %v528_v40 = vmax.f32 %v450_v37, 0.0  ;;  %v465_v42 = vadd.f32 %v1396_v38, %v1260_v32  ;;  %v490_v58 = vadd.f32 %v1260_v32, %v489_v39  ;;  %v537_v4 = vmax.f32 %v495_v63, 0.0 }
  0xe2   : > { %v459_v43 = vpop.f32.mrf.mxu0  ;;  %v1408_v44 = vpop.f32.mrf.mxu1 }
  0xe3   : > { %v460_v45 = vadd.f32 %v1260_v32, %v459_v43  ;;  %1463 = vmatprep.mubr.msk.f32.mxu0 %vm701_vm1, %v528_v40  ;;  %v531_v50 = vmax.f32 %v465_v42, 0.0  ;;  %v536_v1 = vmax.f32 %v490_v58, 0.0  ;;  %v505_v5 = vadd.f32 %v1408_v44, %v1260_v32 }
  0xe4   : > { %v1399_v46 = vpop.f32.mrf.mxu0  ;;  %1464 = vmatmul.mubr.msk.f32.vlgmr.msra.gmra.mxu0 %vm701_vm1, %v529_v41  ;;  %v499_v47 = vpop.f32.mrf.mxu1 }
  0xe5   : > { %v530_v48 = vmax.f32 %v460_v45, 0.0  ;;  %v475_v49 = vadd.f32 %v1399_v46, %v1260_v32  ;;  %v500_v2 = vadd.f32 %v1260_v32, %v499_v47  ;;  %v539_v9 = vmax.f32 %v505_v5, 0.0 }
  0xe6   : > { %v469_v51 = vpop.f32.mrf.mxu0  ;;  %v1411_v52 = vpop.f32.mrf.mxu1 }
  0xe7   : > { %v470_v53 = vadd.f32 %v1260_v32, %v469_v51  ;;  %1466 = vmatprep.mubr.msk.f32.mxu0 %vm701_vm1, %v530_v48  ;;  %v533_v54 = vmax.f32 %v475_v49, 0.0  ;;  %v538_v6 = vmax.f32 %v500_v2, 0.0  ;;  %v515_v10 = vadd.f32 %v1411_v52, %v1260_v32 }
  0xe8   : > { %v1402_v55 = vpop.f32.mrf.mxu0  ;;  %1467 = vmatmul.mubr.msk.f32.gmra.mxu0 %vm701_vm1, %v531_v50  ;;  %v509_v60 = vpop.f32.mrf.mxu1 }
  0xe9   : > { %v532_v56 = vmax.f32 %v470_v53, 0.0  ;;  %v485_v57 = vadd.f32 %v1402_v55, %v1260_v32  ;;  %v510_v7 = vadd.f32 %v1260_v32, %v509_v60  ;;  %v541_v13 = vmax.f32 %v515_v10, 0.0 }
  0xea   : > { %v479_v59 = vpop.f32.mrf.mxu0  ;;  %v1414_v3 = vpop.f32.mrf.mxu1 }
  0xeb   : > { %v480_v61 = vadd.f32 %v1260_v32, %v479_v59  ;;  %1469 = vmatprep.mubr.msk.f32.mxu0 %vm701_vm1, %v532_v56  ;;  %v535_v62 = vmax.f32 %v485_v57, 0.0  ;;  %v540_v11 = vmax.f32 %v510_v7, 0.0  ;;  %v525_v14 = vadd.f32 %v1414_v3, %v1260_v32 }
  0xec   : > { %1470 = vmatmul.mubr.msk.f32.gmra.mxu0 %vm701_vm1, %v533_v54  ;;  %v519_v8 = vpop.f32.mrf.mxu1 }
  0xed   : > { %v534_v0 = vmax.f32 %v480_v61, 0.0  ;;  %v520_v12 = vadd.f32 %v1260_v32, %v519_v8  ;;  %v543_v16 = vmax.f32 %v525_v14, 0.0 }
  0xef   : > { %1472 = vmatprep.mubr.msk.f32.mxu0 %vm701_vm1, %v534_v0  ;;  %v542_v15 = vmax.f32 %v520_v12, 0.0  ;;  %v1425_v17 = vpop.f32.mrf.mxu1 }
  0xf0   : > { %1473 = vmatmul.mubr.msk.f32.gmra.mxu0 %vm701_vm1, %v535_v62 }
  0xf1   : > { %1475 = vmatprep.mubr.msk.f32.mxu0 %vm701_vm1, %v536_v1  ;;  %v622_v18 = vpop.f32.mrf.mxu1 }
  0xf3   : > { %v1428_v19 = vpop.f32.mrf.mxu1 }
  0xf4   : > { %1476 = vmatmul.mubr.msk.f32.gmra.mxu0 %vm701_vm1, %v537_v4 }
  0xf5   : > { %1478 = vmatprep.mubr.msk.f32.mxu0 %vm701_vm1, %v538_v6  ;;  %v632_v20 = vpop.f32.mrf.mxu1 }
  0xf7   : > { %v1431_v21 = vpop.f32.mrf.mxu1 }
  0xf8   : > { %1479 = vmatmul.mubr.msk.f32.gmra.mxu0 %vm701_vm1, %v539_v9 }
  0xf9   : > { %1481 = vmatprep.mubr.msk.f32.mxu0 %vm701_vm1, %v540_v11  ;;  %v642_v22 = vpop.f32.mrf.mxu1 }
  0xfb   : > { %v1434_v23 = vpop.f32.mrf.mxu1 }
  0xfc   : > { %1482 = vmatmul.mubr.msk.f32.gmra.mxu0 %vm701_vm1, %v541_v13 }
  0xfd   : > { %1484 = vmatprep.mubr.msk.f32.mxu0 %vm701_vm1, %v542_v15  ;;  %v652_v24 = vpop.f32.mrf.mxu1 }
  0xff   : > { %v1437_v27 = vpop.f32.mrf.mxu1 }
 0x100   : > { %1485 = vmatmul.mubr.msk.f32.gmra.mxu0 %vm701_vm1, %v543_v16 }
 0x101   : > { %v662_v33 = vpop.f32.mrf.mxu1 }
 0x103   : > { %v1440_v40 = vpop.f32.mrf.mxu1 }
 0x105   : > { %v672_v46 = vpop.f32.mrf.mxu1 }
 0x107   : > { %v1443_v53 = vpop.f32.mrf.mxu1 }
 0x109   : > { %v682_v60 = vpop.f32.mrf.mxu1 }
 0x10b   : > { %v1446_v3 = vpop.f32.mrf.mxu1 }
 0x10d   : > { %v692_v10 = vpop.f32.mrf.mxu1 }
 0x1a4   : > { %v1465_v25 = vpop.f32.mrf.mxu0 }
 0x1a5   : > { %v822_v28 = vadd.f32 %v1465_v25, %v1425_v17 }
 0x1a6   : > { %v816_v29 = vpop.f32.mrf.mxu0 }
 0x1a7   : > { %v817_v30 = vadd.f32 %v816_v29, %v622_v18  ;;  %v1875_v31 = vadd.f32 %v1872_v26, %v822_v28  ;;  %v918_v18 = vlaneseq }
 0x1a8   : > { %v1468_v32 = vpop.f32.mrf.mxu0 }
 0x1a9   : > { %v832_v34 = vadd.f32 %v1468_v32, %v1428_v19  ;;  %925 = vadd.xlane.f32.xlu0 %v1875_v31  ;;  %v1882_v38 = vadd.f32 %v1872_v26, %v817_v30  ;;  %v919_v19 = vand.u32 127, %v918_v18 }
 0x1aa   : > { %v826_v35 = vpop.f32.mrf.mxu0 }
 0x1ab   : > { %v827_v36 = vadd.f32 %v826_v35, %v632_v20  ;;  %v1879_v37 = vadd.f32 %v1872_v26, %v832_v34  ;;  %vm920_vm2 = vcmp.lt.s32.totalorder %v919_v19, 16 }
 0x1ac   : > { %v1471_v39 = vpop.f32.mrf.mxu0 }
 0x1ad   : > { %929 = vadd.xlane.f32.xlu1 %v1879_v37  ;;  %923 = vadd.xlane.f32.xlu0 %v1882_v38  ;;  %v842_v42 = vadd.f32 %v1471_v39, %v1431_v21  ;;  %v1887_v44 = vadd.f32 %v1872_v26, %v827_v36 }
 0x1ae   : > { %v836_v41 = vpop.f32.mrf.mxu0 }
 0x1af   : > { %v837_v43 = vadd.f32 %v836_v41, %v642_v22  ;;  %v1895_v51 = vadd.f32 %v1872_v26, %v842_v42  ;;  %v1631_v22 = vmov 0.0  }
 0x1b0   : > { %v1474_v45 = vpop.f32.mrf.mxu0 }
 0x1b1   : > { %927 = vadd.xlane.f32.xlu1 %v1887_v44  ;;  %v1891_v47 = vadd.f32 %v1872_v26, %v837_v43  ;;  %v852_v49 = vadd.f32 %v1474_v45, %v1434_v23  ;;  %v1938_v23 = vsel %vm920_vm2, 1.0, %v1631_v22 }
 0x1b2   : > { %v846_v48 = vpop.f32.mrf.mxu0 }
 0x1b3   : > { %v847_v50 = vadd.f32 %v846_v48, %v652_v24  ;;  %931 = vadd.xlane.f32.xlu0 %v1891_v47  ;;  %v1903_v58 = vadd.f32 %v1872_v26, %v852_v49 }
 0x1b4   : > { %v1477_v52 = vpop.f32.mrf.mxu0 }
 0x1b5   : > { %933 = vadd.xlane.f32.xlu1 %v1895_v51  ;;  %v1899_v54 = vadd.f32 %v1872_v26, %v847_v50  ;;  %v862_v56 = vadd.f32 %v1477_v52, %v1437_v27 }
 0x1b6   : > { %v856_v55 = vpop.f32.mrf.mxu0 }
 0x1b7   : > { %v857_v57 = vadd.f32 %v856_v55, %v662_v33  ;;  %935 = vadd.xlane.f32.xlu0 %v1899_v54  ;;  %v1911_v1 = vadd.f32 %v1872_v26, %v862_v56 }
 0x1b8   : > { %v1480_v59 = vpop.f32.mrf.mxu0 }
 0x1b9   : > { %937 = vadd.xlane.f32.xlu1 %v1903_v58  ;;  %v1907_v61 = vadd.f32 %v1872_v26, %v857_v57  ;;  %v872_v63 = vadd.f32 %v1480_v59, %v1440_v40 }
 0x1ba   : > { %v866_v62 = vpop.f32.mrf.mxu0 }
 0x1bb   : > { %v867_v0 = vadd.f32 %v866_v62, %v672_v46  ;;  %939 = vadd.xlane.f32.xlu0 %v1907_v61  ;;  %v1919_v8 = vadd.f32 %v1872_v26, %v872_v63 }
 0x1bc   : > { %v1483_v2 = vpop.f32.mrf.mxu0 }
 0x1bd   : > { %941 = vadd.xlane.f32.xlu1 %v1911_v1  ;;  %v1915_v4 = vadd.f32 %v1872_v26, %v867_v0  ;;  %v882_v6 = vadd.f32 %v1483_v2, %v1443_v53 }
 0x1be   : > { %v876_v5 = vpop.f32.mrf.mxu0 }
 0x1bf   : > { %v877_v7 = vadd.f32 %v876_v5, %v682_v60  ;;  %943 = vadd.xlane.f32.xlu0 %v1915_v4  ;;  %v1927_v15 = vadd.f32 %v1872_v26, %v882_v6 }
 0x1c0   : > { %v1486_v9 = vpop.f32.mrf.mxu0 }
 0x1c1   : > { %945 = vadd.xlane.f32.xlu1 %v1919_v8  ;;  %v1923_v11 = vadd.f32 %v1872_v26, %v877_v7  ;;  %v892_v13 = vadd.f32 %v1486_v9, %v1446_v3 }
 0x1c2   : > { %v886_v12 = vpop.f32.mrf.mxu0 }
 0x1c3   : > { %v887_v14 = vadd.f32 %v886_v12, %v692_v10  ;;  %947 = vadd.xlane.f32.xlu0 %v1923_v11  ;;  %v1935_v17 = vadd.f32 %v1872_v26, %v892_v13 }
 0x1c5   : > { %949 = vadd.xlane.f32.xlu1 %v1927_v15  ;;  %v1931_v16 = vadd.f32 %v1872_v26, %v887_v14 }
 0x1c7   : > { %951 = vadd.xlane.f32.xlu0 %v1931_v16 }
 0x1c9   : > { %953 = vadd.xlane.f32.xlu1 %v1935_v17 }
 0x232   : > { %v926_v20 = vpop.xlane.xlu0 %925 }
 0x233   : > { %v956_v21 = vmul.f32 0.0625, %v926_v20 }
 0x235   : > { %v1941_v24 = vsub.f32 %v1875_v31, %v956_v21 }
 0x236   : > { %v930_v25 = vpop.xlane.xlu1 %929  ;;  %v924_v27 = vpop.xlane.xlu0 %923 }
 0x237   : > { %v958_v28 = vmul.f32 0.0625, %v930_v25  ;;  %v955_v29 = vmul.f32 0.0625, %v924_v27  ;;  %v988_v26 = vmul.f32 %v1938_v23, %v1941_v24 }
 0x239   : > { %v1946_v30 = vsub.f32 %v1879_v37, %v958_v28  ;;  %v1949_v32 = vsub.f32 %v1882_v38, %v955_v29  ;;  %v1004_v33 = vmul.f32 %v988_v26, %v1941_v24 }
 0x23a   : > { %v928_v34 = vpop.xlane.xlu1 %927 }
 0x23b   : > { %v957_v35 = vmul.f32 0.0625, %v928_v34  ;;  %1021 = vadd.xlane.f32.xlu1 %v1004_v33  ;;  %v990_v31 = vmul.f32 %v1938_v23, %v1946_v30  ;;  %v987_v36 = vmul.f32 %v1938_v23, %v1949_v32 }
 0x23c   : > { %v932_v39 = vpop.xlane.xlu0 %931 }
 0x23d   : > { %v1957_v40 = vsub.f32 %v1887_v44, %v957_v35  ;;  %v959_v37 = vmul.f32 0.0625, %v932_v39  ;;  %v1006_v41 = vmul.f32 %v990_v31, %v1946_v30  ;;  %v1003_v38 = vmul.f32 %v987_v36, %v1949_v32 }
 0x23e   : > { %v934_v42 = vpop.xlane.xlu1 %933 }
 0x23f   : > { %v1962_v43 = vsub.f32 %v1891_v47, %v959_v37  ;;  %v960_v45 = vmul.f32 0.0625, %v934_v42  ;;  %1025 = vadd.xlane.f32.xlu1 %v1006_v41  ;;  %1019 = vadd.xlane.f32.xlu0 %v1003_v38  ;;  %v989_v46 = vmul.f32 %v1938_v23, %v1957_v40 }
 0x240   : > { %v936_v48 = vpop.xlane.xlu0 %935 }
 0x241   : > { %v1967_v49 = vsub.f32 %v1895_v51, %v960_v45  ;;  %v961_v44 = vmul.f32 0.0625, %v936_v48  ;;  %v1005_v50 = vmul.f32 %v989_v46, %v1957_v40  ;;  %v991_v52 = vmul.f32 %v1938_v23, %v1962_v43 }
 0x242   : > { %v938_v53 = vpop.xlane.xlu1 %937 }
 0x243   : > { %v1973_v47 = vsub.f32 %v1899_v54, %v961_v44  ;;  %v962_v55 = vmul.f32 0.0625, %v938_v53  ;;  %1023 = vadd.xlane.f32.xlu0 %v1005_v50  ;;  %v992_v56 = vmul.f32 %v1938_v23, %v1967_v49  ;;  %v1007_v59 = vmul.f32 %v991_v52, %v1962_v43 }
 0x244   : > { %v940_v57 = vpop.xlane.xlu0 %939 }
 0x245   : > { %v1979_v51 = vsub.f32 %v1903_v58, %v962_v55  ;;  %v963_v60 = vmul.f32 0.0625, %v940_v57  ;;  %v1008_v62 = vmul.f32 %v992_v56, %v1967_v49  ;;  %v993_v63 = vmul.f32 %v1938_v23, %v1973_v47 }
 0x246   : > { %v942_v0 = vpop.xlane.xlu1 %941 }
 0x247   : > { %v1985_v54 = vsub.f32 %v1907_v61, %v963_v60  ;;  %v964_v2 = vmul.f32 0.0625, %v942_v0  ;;  %1029 = vadd.xlane.f32.xlu1 %v1008_v62  ;;  %1027 = vadd.xlane.f32.xlu0 %v1007_v59  ;;  %v994_v3 = vmul.f32 %v1938_v23, %v1979_v51  ;;  %v1009_v58 = vmul.f32 %v993_v63, %v1973_v47 }
 0x248   : > { %v944_v5 = vpop.xlane.xlu0 %943 }
 0x249   : > { %v1991_v6 = vsub.f32 %v1911_v1, %v964_v2  ;;  %v965_v7 = vmul.f32 0.0625, %v944_v5  ;;  %v1010_v9 = vmul.f32 %v994_v3, %v1979_v51  ;;  %v995_v10 = vmul.f32 %v1938_v23, %v1985_v54 }
 0x24a   : > { %v946_v61 = vpop.xlane.xlu1 %945 }
 0x24b   : > { %v1997_v12 = vsub.f32 %v1915_v4, %v965_v7  ;;  %v966_v13 = vmul.f32 0.0625, %v946_v61  ;;  %1033 = vadd.xlane.f32.xlu1 %v1010_v9  ;;  %1031 = vadd.xlane.f32.xlu0 %v1009_v58  ;;  %v996_v14 = vmul.f32 %v1938_v23, %v1991_v6  ;;  %v1011_v1 = vmul.f32 %v995_v10, %v1985_v54  ;;  %v2040_v61 = vld [vmem:[%s2172_s6] ss:$0 sm:$0xff] }
 0x24c   : > { %v948_v18 = vpop.xlane.xlu0 %947 }
 0x24d   : > { %v2003_v19 = vsub.f32 %v1919_v8, %v966_v13  ;;  %v967_v20 = vmul.f32 0.0625, %v948_v18  ;;  %v1012_v21 = vmul.f32 %v996_v14, %v1991_v6  ;;  %v997_v22 = vmul.f32 %v1938_v23, %v1997_v12 }
 0x24e   : > { %v950_v4 = vpop.xlane.xlu1 %949 }
 0x24f   : > { %v2009_v25 = vsub.f32 %v1923_v11, %v967_v20  ;;  %v968_v27 = vmul.f32 0.0625, %v950_v4  ;;  %1037 = vadd.xlane.f32.xlu1 %v1012_v21  ;;  %1035 = vadd.xlane.f32.xlu0 %v1011_v1  ;;  %v998_v28 = vmul.f32 %v1938_v23, %v2003_v19  ;;  %v1013_v8 = vmul.f32 %v997_v22, %v1997_v12  ;;  %v2048_v1 = vld [vmem:[%s2173_s7] ss:$0 sm:$0xff] }
 0x250   : > { %v952_v29 = vpop.xlane.xlu0 %951 }
 0x251   : > { %v2015_v26 = vsub.f32 %v1927_v15, %v968_v27  ;;  %v969_v33 = vmul.f32 0.0625, %v952_v29  ;;  %v1014_v34 = vmul.f32 %v998_v28, %v2003_v19  ;;  %v999_v35 = vmul.f32 %v1938_v23, %v2009_v25 }
 0x252   : > { %v954_v11 = vpop.xlane.xlu1 %953 }
 0x253   : > { %v2021_v31 = vsub.f32 %v1931_v16, %v969_v33  ;;  %v970_v36 = vmul.f32 0.0625, %v954_v11  ;;  %1041 = vadd.xlane.f32.xlu1 %v1014_v34  ;;  %1039 = vadd.xlane.f32.xlu0 %v1013_v8  ;;  %v1000_v39 = vmul.f32 %v1938_v23, %v2015_v26  ;;  %v1015_v41 = vmul.f32 %v999_v35, %v2009_v25 }
 0x255   : > { %v2026_v37 = vsub.f32 %v1935_v17, %v970_v36  ;;  %v1016_v15 = vmul.f32 %v1000_v39, %v2015_v26  ;;  %v1001_v38 = vmul.f32 %v1938_v23, %v2021_v31 }
 0x257   : > { %1045 = vadd.xlane.f32.xlu1 %v1016_v15  ;;  %1043 = vadd.xlane.f32.xlu0 %v1015_v41  ;;  %v1002_v16 = vmul.f32 %v1938_v23, %v2026_v37  ;;  %v1017_v45 = vmul.f32 %v1001_v38, %v2021_v31 }
 0x259   : > { %v1018_v42 = vmul.f32 %v1002_v16, %v2026_v37 }
 0x25b   : > { %1049 = vadd.xlane.f32.xlu1 %v1018_v42  ;;  %1047 = vadd.xlane.f32.xlu0 %v1017_v45 }
 0x2c4   : > { %v1022_v17 = vpop.xlane.xlu1 %1021 }
 0x2c5   : > { %v1052_v46 = vmul.f32 0.0625, %v1022_v17 }
 0x2c7   : > { %v1068_v48 = vadd.f32 1e-05, %v1052_v46 }
 0x2c8   : > { %v1026_v44 = vpop.xlane.xlu1 %1025  ;;  %v1020_v50 = vpop.xlane.xlu0 %1019 }
 0x2c9   : > { %1537 = vrsqrt.f32 %v1068_v48  ;;  %v1054_v52 = vmul.f32 0.0625, %v1026_v44  ;;  %v1051_v53 = vmul.f32 0.0625, %v1020_v50 }
 0x2cb   : > { %v1070_v55 = vadd.f32 1e-05, %v1054_v52  ;;  %v1067_v56 = vadd.f32 1e-05, %v1051_v53 }
 0x2cc   : > { %v1024_v57 = vpop.xlane.xlu0 %1023 }
 0x2cd   : > { %1539 = vrsqrt.f32 %v1070_v55  ;;  %v1053_v23 = vmul.f32 0.0625, %v1024_v57 }
 0x2ce   : > { %1541 = vrsqrt.f32 %v1067_v56 }
 0x2cf   : > { %v1069_v59 = vadd.f32 1e-05, %v1053_v23 }
 0x2d0   : > { %v1030_v60 = vpop.xlane.xlu1 %1029  ;;  %v1028_v62 = vpop.xlane.xlu0 %1027 }
 0x2d1   : > { %1543 = vrsqrt.f32 %v1069_v59  ;;  %v1056_v63 = vmul.f32 0.0625, %v1030_v60  ;;  %v1055_v0 = vmul.f32 0.0625, %v1028_v62 }
 0x2d3   : > { %v1072_v2 = vadd.f32 1e-05, %v1056_v63  ;;  %v1071_v3 = vadd.f32 1e-05, %v1055_v0 }
 0x2d4   : > { %v1034_v5 = vpop.xlane.xlu1 %1033  ;;  %v1032_v58 = vpop.xlane.xlu0 %1031 }
 0x2d5   : > { %1545 = vrsqrt.f32 %v1072_v2  ;;  %v1058_v7 = vmul.f32 0.0625, %v1034_v5  ;;  %v1057_v9 = vmul.f32 0.0625, %v1032_v58 }
 0x2d6   : > { %v1538_v10 = vpop.eup %1537  ;;  %1547 = vrsqrt.f32 %v1071_v3 }
 0x2d7   : > { %v1100_v13 = vmul.f32 %v1538_v10, %v1941_v24  ;;  %v1074_v14 = vadd.f32 1e-05, %v1058_v7  ;;  %v1073_v18 = vadd.f32 1e-05, %v1057_v9 }
 0x2d8   : > { %v1038_v20 = vpop.xlane.xlu1 %1037  ;;  %v1036_v21 = vpop.xlane.xlu0 %1035 }
 0x2d9   : > { %v1123_v22 = vmul.f32 %v2040_v61, %v1100_v13  ;;  %1549 = vrsqrt.f32 %v1074_v14  ;;  %v1060_v4 = vmul.f32 0.0625, %v1038_v20  ;;  %v1059_v27 = vmul.f32 0.0625, %v1036_v21 }
 0x2da   : > { %v1540_v28 = vpop.eup %1539  ;;  %1551 = vrsqrt.f32 %v1073_v18 }
 0x2db   : > { %v1542_v29 = vpop.eup %1541  ;;  %v1146_v8 = vadd.f32 %v2048_v1, %v1123_v22  ;;  %v1102_v24 = vmul.f32 %v1540_v28, %v1946_v30  ;;  %v1076_v33 = vadd.f32 1e-05, %v1060_v4  ;;  %v1075_v34 = vadd.f32 1e-05, %v1059_v27 }
 0x2dc   : > { %v1099_v35 = vmul.f32 %v1542_v29, %v1949_v32  ;;  %v1042_v11 = vpop.xlane.xlu1 %1041  ;;  %v1040_v36 = vpop.xlane.xlu0 %1039 }
 0x2dd   : > { %1162 = vst [vmem:[%s2054_s25 + $0x8] sm:$0xff] %v1146_v8  ;;  %v1125_v39 = vmul.f32 %v2040_v61, %v1102_v24  ;;  %1553 = vrsqrt.f32 %v1076_v33  ;;  %v1062_v15 = vmul.f32 0.0625, %v1042_v11  ;;  %v1061_v41 = vmul.f32 0.0625, %v1040_v36 }
 0x2de   : > { %v1544_v38 = vpop.eup %1543  ;;  %v1122_v30 = vmul.f32 %v2040_v61, %v1099_v35  ;;  %1555 = vrsqrt.f32 %v1075_v34 }
 0x2df   : > { %v1148_v16 = vadd.f32 %v2048_v1, %v1125_v39  ;;  %v1101_v32 = vmul.f32 %v1544_v38, %v1957_v40  ;;  %v1078_v42 = vadd.f32 1e-05, %v1062_v15  ;;  %v1077_v45 = vadd.f32 1e-05, %v1061_v41 }
 0x2e0   : > { %v1145_v17 = vadd.f32 %v2048_v1, %v1122_v30  ;;  %v1046_v46 = vpop.xlane.xlu1 %1045  ;;  %v1044_v48 = vpop.xlane.xlu0 %1043 }
 0x2e1   : > { %1164 = vst [vmem:[%s2054_s25 + $0x18] sm:$0xff] %v1148_v16  ;;  %v1124_v44 = vmul.f32 %v2040_v61, %v1101_v32  ;;  %1557 = vrsqrt.f32 %v1078_v42  ;;  %v1064_v50 = vmul.f32 0.0625, %v1046_v46  ;;  %v1063_v52 = vmul.f32 0.0625, %v1044_v48 }
 0x2e2   : > { %v1546_v53 = vpop.eup %1545  ;;  %1161 = vst [vmem:[%s2054_s25] sm:$0xff] %v1145_v17  ;;  %1559 = vrsqrt.f32 %v1077_v45 }
 0x2e3   : > { %v1548_v55 = vpop.eup %1547  ;;  %v1147_v56 = vadd.f32 %v2048_v1, %v1124_v44  ;;  %v1104_v40 = vmul.f32 %v1546_v53, %v1967_v49  ;;  %v1080_v57 = vadd.f32 1e-05, %v1064_v50  ;;  %v1079_v23 = vadd.f32 1e-05, %v1063_v52 }
 0x2e4   : > { %v1103_v59 = vmul.f32 %v1548_v55, %v1962_v43  ;;  %v1050_v60 = vpop.xlane.xlu1 %1049  ;;  %v1048_v62 = vpop.xlane.xlu0 %1047 }
 0x2e5   : > { %1163 = vst [vmem:[%s2054_s25 + $0x10] sm:$0xff] %v1147_v56  ;;  %v1127_v63 = vmul.f32 %v2040_v61, %v1104_v40  ;;  %1561 = vrsqrt.f32 %v1080_v57  ;;  %v1066_v0 = vmul.f32 0.0625, %v1050_v60  ;;  %v1065_v2 = vmul.f32 0.0625, %v1048_v62 }
 0x2e6   : > { %v1550_v3 = vpop.eup %1549  ;;  %v1126_v5 = vmul.f32 %v2040_v61, %v1103_v59  ;;  %1563 = vrsqrt.f32 %v1079_v23 }
 0x2e7   : > { %v1552_v58 = vpop.eup %1551  ;;  %v1150_v49 = vadd.f32 %v2048_v1, %v1127_v63  ;;  %v1106_v7 = vmul.f32 %v1550_v3, %v1979_v51  ;;  %v1082_v43 = vadd.f32 1e-05, %v1066_v0  ;;  %v1081_v9 = vadd.f32 1e-05, %v1065_v2 }
 0x2e8   : > { %v1149_v10 = vadd.f32 %v2048_v1, %v1126_v5  ;;  %v1105_v13 = vmul.f32 %v1552_v58, %v1973_v47 }
 0x2e9   : > { %1166 = vst [vmem:[%s2054_s25 + $0x28] sm:$0xff] %v1150_v49  ;;  %v1129_v14 = vmul.f32 %v2040_v61, %v1106_v7  ;;  %1565 = vrsqrt.f32 %v1082_v43 }
 0x2ea   : > { %v1554_v18 = vpop.eup %1553  ;;  %1165 = vst [vmem:[%s2054_s25 + $0x20] sm:$0xff] %v1149_v10  ;;  %v1128_v20 = vmul.f32 %v2040_v61, %v1105_v13  ;;  %1567 = vrsqrt.f32 %v1081_v9 }
 0x2eb   : > { %v1556_v21 = vpop.eup %1555  ;;  %v1152_v51 = vadd.f32 %v2048_v1, %v1129_v14  ;;  %v1108_v22 = vmul.f32 %v1554_v18, %v1991_v6 }
 0x2ec   : > { %v1151_v4 = vadd.f32 %v2048_v1, %v1128_v20  ;;  %v1107_v47 = vmul.f32 %v1556_v21, %v1985_v54 }
 0x2ed   : > { %1168 = vst [vmem:[%s2054_s25 + $0x38] sm:$0xff] %v1152_v51  ;;  %v1131_v27 = vmul.f32 %v2040_v61, %v1108_v22 }
 0x2ee   : > { %v1558_v28 = vpop.eup %1557  ;;  %1167 = vst [vmem:[%s2054_s25 + $0x30] sm:$0xff] %v1151_v4  ;;  %v1130_v29 = vmul.f32 %v2040_v61, %v1107_v47 }
 0x2ef   : > { %v1560_v8 = vpop.eup %1559  ;;  %v1154_v24 = vadd.f32 %v2048_v1, %v1131_v27  ;;  %v1110_v33 = vmul.f32 %v1558_v28, %v2003_v19 }
 0x2f0   : > { %v1153_v6 = vadd.f32 %v2048_v1, %v1130_v29  ;;  %v1109_v34 = vmul.f32 %v1560_v8, %v1997_v12 }
 0x2f1   : > { %1170 = vst [vmem:[%s2054_s25 + $0x48] sm:$0xff] %v1154_v24  ;;  %v1133_v54 = vmul.f32 %v2040_v61, %v1110_v33 }
 0x2f2   : > { %v1562_v35 = vpop.eup %1561  ;;  %1169 = vst [vmem:[%s2054_s25 + $0x40] sm:$0xff] %v1153_v6  ;;  %v1132_v11 = vmul.f32 %v2040_v61, %v1109_v34 }
 0x2f3   : > { %v1564_v36 = vpop.eup %1563  ;;  %v1156_v39 = vadd.f32 %v2048_v1, %v1133_v54  ;;  %v1112_v19 = vmul.f32 %v1562_v35, %v2015_v26 }
 0x2f4   : > { %v1155_v15 = vadd.f32 %v2048_v1, %v1132_v11  ;;  %v1111_v12 = vmul.f32 %v1564_v36, %v2009_v25 }
 0x2f5   : > { %1172 = vst [vmem:[%s2054_s25 + $0x58] sm:$0xff] %v1156_v39  ;;  %v1135_v41 = vmul.f32 %v2040_v61, %v1112_v19 }
 0x2f6   : > { %v1566_v38 = vpop.eup %1565  ;;  %1171 = vst [vmem:[%s2054_s25 + $0x50] sm:$0xff] %v1155_v15  ;;  %v1134_v30 = vmul.f32 %v2040_v61, %v1111_v12 }
 0x2f7   : > { %v1568_v16 = vpop.eup %1567  ;;  %v1158_v32 = vadd.f32 %v2048_v1, %v1135_v41  ;;  %v1114_v26 = vmul.f32 %v1566_v38, %v2026_v37 }
 0x2f8   : > { %v1157_v42 = vadd.f32 %v2048_v1, %v1134_v30  ;;  %v1113_v45 = vmul.f32 %v1568_v16, %v2021_v31 }
 0x2f9   : > { %1174 = vst [vmem:[%s2054_s25 + $0x68] sm:$0xff] %v1158_v32  ;;  %v1137_v25 = vmul.f32 %v2040_v61, %v1114_v26 }
 0x2fa   : > { %1173 = vst [vmem:[%s2054_s25 + $0x60] sm:$0xff] %v1157_v42  ;;  %v1136_v17 = vmul.f32 %v2040_v61, %v1113_v45 }
 0x2fb   : > { %v1160_v46 = vadd.f32 %v2048_v1, %v1137_v25 }
 0x2fc   : > { %v1159_v31 = vadd.f32 %v2048_v1, %v1136_v17 }
 0x2fd   : > { %1176 = vst [vmem:[%s2054_s25 + $0x78] sm:$0xff] %v1160_v46 }
 0x2fe   : > { %1175 = vst [vmem:[%s2054_s25 + $0x70] sm:$0xff] %v1159_v31 }
 0x2ff   : > { %1582 = shalt.err (!%p1579_p3)
}
 0x300   : > { %s1583_s20 = scalar_lea.hbm %s2117_s18, 2048  ;;  %s1587_s25 = scalar_lea.hbm %s2174_s8, 4096 }
 0x301   : > { %p1584_p4 = scmp.ne.s32.totalorder %s2117_s18, %s1583_s20  ;;  %p1588_p9 = scmp.lt.s32.totalorder %s2117_s18, %s2174_s8 }
 0x302   : > { %p1589_p10 = scmp.lt.s32.totalorder %s1587_s25, %s1583_s20 }
 0x303   : > { %p1585_p7 = pnand %p1584_p4, %p1718_p5 }
 0x304   : > { %p1590_p11 = por %p1589_p10, %p1588_p9 }
 0x305   : > { %p1586_p8 = pneg %p1585_p7 }
 0x307   : > { %p1591_p12 = pnand %p1590_p11, %p1586_p8 }
 0x309   : > { %1594 = shalt.err (!%p1591_p12)
}
 0x30a   : > { %s1633_s17 = smov 128   ;;  %s1634_s19 = smov 8  }
 0x30b   : > { %1495 = dma.vmem_to_hbm [thread:$0]  (%p1718_p5), %s2119_s10, 2048, %s2117_s18, %s2126_s9, %s1633_s17, %s1633_s17, %s1634_s19  }
 0x30c PF: > { %p1501_p13 = scmp.ge.s32.totalorder %s1629_s30, 2  ;;  %s1206_s21 = sand.u32 1, %s1617_s27  }
 0x30d   : > { %s1207_s22 = scalar_lea.sflag [#allocation3], %s1206_s21 }
 0x30e   : > { %p1498_p0 = pnand %p1501_p13, %p1722_p6 }
 0x310   : > { %p1499_p1 = pneg %p1498_p0 }
 0x312   : > { %1612 = dma.done.wait (%p1499_p1), %s1207_s22, 2048  }
 0x313   : > { %1614 = vsyncadd (%p1499_p1), %s1207_s22, 4294965248  ;;  %p18_p2 = scmp.ge.s32.totalorder %s1705_s11, 4   ;;  %s2177_s27 = smov %s1621_s28 }
 0x314   : > { %s2178_s28 = smov %s1625_s29  ;;  %s2179_s29 = smov %s1716_s14 }
 0x315   : > { %s2180_s30 = smov %s1705_s11  ;;  %20 = sbr.rel (!%p18_p2) target bundleno = 3 (0x3), region = 87 }
 0x31a   :  { %1212 = vsyncpa [#allocation3], 1 }
 0x31b   :  { %1214 = vsyncpa [#allocation3 + $0x1], 1 }

</bundles_post_ra>
